<compile_context>
chip_gen: v5e
topology: v5e:2x2
jax: 0.10.0
libtpu: 0.0.40
codegen_flags: <defaults>
</compile_context>

<pallas_src>
import numpy as np
import jax
import jax.numpy as jnp
from jax.experimental import pallas as pl
from jax.experimental.pallas import tpu as pltpu

BN_EPS = 1e-5
_HIGHEST = jax.lax.Precision.HIGHEST


def _round_up(x: int, m: int) -> int:
    return ((x + m - 1) // m) * m


def _make_kernel(F: int, FN_pad: int):
    """One batch tile.  Transposed layout: features on sublanes, batch on lanes."""

    def kernel(pos_ref, gt_ref, b1_ref, w2_ref, csq_ref, clin_ref, b2_ref, out_ref):
        tb = pos_ref.shape[1]
        pos = pos_ref[...]                                        # (F, TB) int32

        # One-hot "gather matrix": oh[p, b] = 1 iff p == pos[f, b] for some field f.
        # F is small & static -> statically unrolled full-width compares; no
        # slicing of the batch axis, no relayouts.
        iota = jax.lax.broadcasted_iota(jnp.int32, (FN_pad, tb), 0)
        oh = jnp.zeros((FN_pad, tb), jnp.float32)
        for f in range(F):
            oh = oh + (iota == pos[f:f + 1, :]).astype(jnp.float32)

        # Single MXU matmul produces, per batch column:
        #   rows [0:D)   : deep pre-activation (BN already folded into G / b1)
        #   rows [D:D+E) : sum over fields of the embeddings
        #   row  D+E     : FM linear term
        #   row  D+E+1   : sum over fields/dims of squared embeddings
        big = jnp.dot(gt_ref[...], oh, preferred_element_type=jnp.float32,
                      precision=_HIGHEST)                          # (NOUT_pad, TB)

        # Deep head: ReLU then per-row head weight (w2 is zero outside [0:D)).
        deep = jnp.maximum(big + b1_ref[...], 0.0) * w2_ref[...]
        # FM terms: 0.5*sum^2 on the E sum-rows, +1 on fm_lin, -0.5 on sum-sq.
        fm = big * (big * csq_ref[...] + clin_ref[...])
        logit = jnp.sum(deep + fm, axis=0, keepdims=True) + b2_ref[0]   # (1, TB)
        out_ref[...] = jax.nn.sigmoid(logit)

    return kernel


def _prepare_params(params, field_dims, embed_dim):
    """One-time parameter transform -> (G^T, b1 col, w2 col, FM coef cols, b2)."""
    F = len(field_dims)
    E = embed_dim
    n = int(sum(field_dims))

    w1, b1 = params["w1"], params["b1"]                   # (F*E, D), (D,)
    D = w1.shape[1]
    gamma, beta = params["bn_gamma"], params["bn_beta"]
    mean, var = params["bn_mean"], params["bn_var"]

    # Fold inference BatchNorm into the first Linear.
    scale = gamma * jax.lax.rsqrt(var + BN_EPS)
    w1f = w1 * scale[None, :]
    b1f = (b1 - mean) * scale + beta

    emb = params["embed_weight"]                          # (n, E)
    fc = params["fc_weight"]                              # (n, 1)

    # Per-field expanded table  G[f*n + j] =
    #   [ emb[j] @ w1f_f  |  emb[j]  |  fc[j]  |  sum_e emb[j,e]^2 ]
    gdeep = jnp.einsum("ne,fed->fnd", emb, w1f.reshape(F, E, D), precision=_HIGHEST)
    gsum = jnp.broadcast_to(emb[None], (F, n, E))
    glin = jnp.broadcast_to(fc[None], (F, n, 1))
    gsq = jnp.broadcast_to(jnp.sum(emb * emb, axis=1, keepdims=True)[None], (F, n, 1))
    n_out = D + E + 2
    G = jnp.concatenate([gdeep, gsum, glin, gsq], axis=2).reshape(F * n, n_out)

    # Per-row coefficient columns applied after the matmul.
    zE2 = jnp.zeros((E + 2,), jnp.float32)
    b1c = jnp.concatenate([b1f, zE2])[:, None]                                  # (n_out, 1)
    w2c = jnp.concatenate([params["w2"][:, 0], zE2])[:, None]
    csq = jnp.concatenate([jnp.zeros((D,)), 0.5 * jnp.ones((E,)),
                           jnp.zeros((2,))])[:, None]
    clin = jnp.concatenate([jnp.zeros((D + E,)), jnp.array([1.0, -0.5])])[:, None]
    b2s = params["b2"].reshape(1)

    # Pad to clean sublane/lane multiples (zeros -> no effect on the result).
    FN = F * n
    FN_pad = _round_up(FN, 128)
    NOUT_pad = _round_up(n_out, 8)
    g_t = jnp.pad(G.T, ((0, NOUT_pad - n_out), (0, FN_pad - FN)))
    pad_r = ((0, NOUT_pad - n_out), (0, 0))
    b1c, w2c, csq, clin = (jnp.pad(a.astype(jnp.float32), pad_r)
                           for a in (b1c, w2c, csq, clin))
    return g_t, b1c, w2c, csq, clin, b2s, n, FN_pad, NOUT_pad


def _padded_bytes(shape, itemsize=4):
    """Physical VMEM bytes of a 2-D block after (8, 128) tiling."""
    return _round_up(shape[-2], 8) * _round_up(shape[-1], 128) * itemsize


def _pick_batch_tile(B: int, tb_max: int = 4096) -> int:
    """Large tiles to amortize per-step overhead; balanced/even tile count when
    B is large so the "parallel" batch axis can shard across v7x's 2 cores."""
    if B <= tb_max:
        return _round_up(B, 128)
    n_tiles = -(-B // tb_max)
    if n_tiles % 2:
        n_tiles += 1
    return _round_up(-(-B // n_tiles), 128)


def deepfm_forward(x, params, field_dims, embed_dim):
    """x: (B, F) int32 per-field indices.  Returns (B,) float32 CTR predictions."""
    B, F = x.shape
    g_t, b1c, w2c, csq, clin, b2s, n, FN_pad, NOUT_pad = _prepare_params(
        params, field_dims, embed_dim)

    # Row index into G for (batch b, field f): f*n + local_idx + field_offset.
    offsets = jnp.asarray(np.array((0, *np.cumsum(field_dims)[:-1]), dtype=np.int32))
    bases = jnp.arange(F, dtype=jnp.int32) * n
    pos = (x.astype(jnp.int32) + offsets[None, :] + bases[None, :]).T   # (F, B)

    TB = _pick_batch_tile(B)
    B_pad = _round_up(B, TB)
    if B_pad != B:
        pos = jnp.pad(pos, ((0, 0), (0, B_pad - B)))
    grid = (B_pad // TB,)

    # Lane-padded VMEM budget: double-buffered blocks + intermediates headroom.
    vmem_need = (2 * (_padded_bytes((F, TB)) + _padded_bytes((NOUT_pad, FN_pad))
                      + 4 * _padded_bytes((NOUT_pad, 1)) + _padded_bytes((1, TB)))
                 + 4 * _padded_bytes((NOUT_pad, TB)) + 3 * _padded_bytes((FN_pad, TB)))
    vmem_limit = int(min(48 << 20, max(32 << 20, 2 * vmem_need)))

    out = pl.pallas_call(
        _make_kernel(F, FN_pad),
        out_shape=jax.ShapeDtypeStruct((1, B_pad), jnp.float32),
        grid=grid,
        in_specs=[
            pl.BlockSpec((F, TB), lambda i: (0, i)),           # field indices (batch tile)
            pl.BlockSpec((NOUT_pad, FN_pad), lambda i: (0, 0)),  # G^T (VMEM-resident)
            pl.BlockSpec((NOUT_pad, 1), lambda i: (0, 0)),     # b1 (BN-folded)
            pl.BlockSpec((NOUT_pad, 1), lambda i: (0, 0)),     # w2 head weights
            pl.BlockSpec((NOUT_pad, 1), lambda i: (0, 0)),     # FM square coefficients
            pl.BlockSpec((NOUT_pad, 1), lambda i: (0, 0)),     # FM linear coefficients
            pl.BlockSpec(memory_space=pltpu.MemorySpace.SMEM),  # b2 scalar
        ],
        out_specs=pl.BlockSpec((1, TB), lambda i: (0, i)),     # lane-dense output row
        compiler_params=pltpu.CompilerParams(
            dimension_semantics=("parallel",),
            vmem_limit_bytes=vmem_limit,
        ),
    )(pos, g_t, b1c, w2c, csq, clin, b2s)

    return out[0, :B]                                          # (B,)


def init_params(key, field_dims, embed_dim, deep_output_dim):
    n_features = int(sum(field_dims))
    F = len(field_dims)
    in_dim = F * embed_dim
    D = deep_output_dim
    k = jax.random.split(key, 6)
    return {
        # FMLinear: nn.Embedding(sum(field_dims), 1)
        "fc_weight": jax.random.normal(k[0], (n_features, 1), jnp.float32) * 0.1,
        # FeatureEmbedding: nn.Embedding(sum(field_dims), embed_dim)
        "embed_weight": jax.random.uniform(
            k[1], (n_features, embed_dim), jnp.float32, -0.3, 0.3),
        # Deep: Linear(in_dim, D)
        "w1": jax.random.normal(k[2], (in_dim, D), jnp.float32) * (1.0 / np.sqrt(in_dim)),
        "b1": jax.random.normal(k[3], (D,), jnp.float32) * 0.01,
        # BatchNorm1d(D) params / running stats (default init)
        "bn_gamma": jnp.ones((D,), jnp.float32),
        "bn_beta": jnp.zeros((D,), jnp.float32),
        "bn_mean": jnp.zeros((D,), jnp.float32),
        "bn_var": jnp.ones((D,), jnp.float32),
        # Deep head: Linear(D, 1)
        "w2": jax.random.normal(k[4], (D, 1), jnp.float32) * (1.0 / np.sqrt(D)),
        "b2": jax.random.normal(k[5], (1,), jnp.float32) * 0.01,
    }


def _reference(x, params, field_dims, embed_dim):
    """Pure-JAX reference matching the PyTorch module (inference mode)."""
    offsets = jnp.asarray(np.array((0, *np.cumsum(field_dims)[:-1]), dtype=np.int32))
    idx = x.astype(jnp.int32) + offsets[None, :]
    lin = jnp.sum(jnp.take(params["fc_weight"], idx, axis=0)[..., 0], axis=1, keepdims=True)
    emb = jnp.take(params["embed_weight"], idx, axis=0)              # (B, F, E)
    sos = jnp.sum(emb, axis=1) ** 2
    sqs = jnp.sum(emb ** 2, axis=1)
    fm_int = 0.5 * jnp.sum(sos - sqs, axis=1, keepdims=True)
    flat = emb.reshape(x.shape[0], -1)
    h = jnp.dot(flat, params["w1"], precision=_HIGHEST) + params["b1"]
    h = ((h - params["bn_mean"]) / jnp.sqrt(params["bn_var"] + BN_EPS)
         * params["bn_gamma"] + params["bn_beta"])
    h = jnp.maximum(h, 0.0)
    deep = jnp.dot(h, params["w2"], precision=_HIGHEST) + params["b2"]
    return jax.nn.sigmoid((lin + fm_int + deep)[:, 0])


if __name__ == "__main__":
    field_dims = [3, 4, 5]       # num_field F = 3, total features = 12
    embed_dim = 8
    deep_output_dim = 32
    batch = 8

    key = jax.random.PRNGKey(0)
    pkey, xkey = jax.random.split(key)
    params = init_params(pkey, field_dims, embed_dim, deep_output_dim)

    # Integer field indices: x[:, f] in [0, field_dims[f])
    xkeys = jax.random.split(xkey, len(field_dims))
    cols = [jax.random.randint(xkeys[f], (batch,), 0, field_dims[f], jnp.int32)
            for f in range(len(field_dims))]
    x = jnp.stack(cols, axis=1)   # (B, F) int32

    out = jax.block_until_ready(deepfm_forward(x, params, field_dims, embed_dim))
    ref = jax.block_until_ready(_reference(x, params, field_dims, embed_dim))

    assert out.shape == (batch,)
    assert bool(jnp.all(jnp.isfinite(out)))
    assert bool(jnp.allclose(out, ref, atol=1e-4, rtol=1e-4)), (out, ref)
    print("KERNEL_OK")
</pallas_src>

<mosaic_0001>
module attributes {stable_mosaic.version = 11 : i64} {
  func.func @kernel(%arg0: i32, %arg1: memref<3x128xi32, #tpu.memory_space<vmem>>, %arg2: memref<48x128xf32, #tpu.memory_space<vmem>>, %arg3: memref<48x1xf32, #tpu.memory_space<vmem>>, %arg4: memref<48x1xf32, #tpu.memory_space<vmem>>, %arg5: memref<48x1xf32, #tpu.memory_space<vmem>>, %arg6: memref<48x1xf32, #tpu.memory_space<vmem>>, %arg7: memref<1xf32, #tpu.memory_space<smem>>, %arg8: memref<1x128xf32, #tpu.memory_space<vmem>>) attributes {dimension_semantics = [#tpu.dimension_semantics<parallel>], iteration_bounds = array<i64: 1>, scalar_prefetch = 0 : i64, scratch_operands = 0 : i64, tpu.core_type = #tpu.core_type<tc>, window_params = [{transform_indices = @transform_0, window_bounds = array<i64: 3, 128>}, {pipeline_mode = #tpu.pipeline_mode<synchronous>, transform_indices = @transform_1, window_bounds = array<i64: 48, 128>}, {pipeline_mode = #tpu.pipeline_mode<synchronous>, transform_indices = @transform_2, window_bounds = array<i64: 48, 1>}, {pipeline_mode = #tpu.pipeline_mode<synchronous>, transform_indices = @transform_3, window_bounds = array<i64: 48, 1>}, {pipeline_mode = #tpu.pipeline_mode<synchronous>, transform_indices = @transform_4, window_bounds = array<i64: 48, 1>}, {pipeline_mode = #tpu.pipeline_mode<synchronous>, transform_indices = @transform_5, window_bounds = array<i64: 48, 1>}, {transform_indices = @transform_6, window_bounds = array<i64: 1>}, {transform_indices = @transform_7, window_bounds = array<i64: 1, 128>}]} {
    %c0 = arith.constant 0 : index
    %c0_0 = arith.constant 0 : index
    %0 = vector.load %arg1[%c0, %c0_0] : memref<3x128xi32, #tpu.memory_space<vmem>>, vector<3x128xi32>
    %1 = tpu.iota {dimensions = array<i32: 0>} : vector<128x128xi32>
    %cst = arith.constant 0.000000e+00 : f32
    %2 = vector.broadcast %cst : f32 to vector<128x128xf32>
    %3 = vector.extract_strided_slice %0 {offsets = [0, 0], sizes = [1, 128], strides = [1, 1]} : vector<3x128xi32> to vector<1x128xi32>
    %4 = vector.broadcast %3 : vector<1x128xi32> to vector<128x128xi32>
    %5 = arith.cmpi eq, %1, %4 : vector<128x128xi32>
    %6 = arith.extui %5 : vector<128x128xi1> to vector<128x128xi32>
    %7 = arith.sitofp %6 : vector<128x128xi32> to vector<128x128xf32>
    %8 = arith.addf %2, %7 : vector<128x128xf32>
    %9 = vector.extract_strided_slice %0 {offsets = [1, 0], sizes = [1, 128], strides = [1, 1]} : vector<3x128xi32> to vector<1x128xi32>
    %10 = vector.broadcast %9 : vector<1x128xi32> to vector<128x128xi32>
    %11 = arith.cmpi eq, %1, %10 : vector<128x128xi32>
    %12 = arith.extui %11 : vector<128x128xi1> to vector<128x128xi32>
    %13 = arith.sitofp %12 : vector<128x128xi32> to vector<128x128xf32>
    %14 = arith.addf %8, %13 : vector<128x128xf32>
    %15 = vector.extract_strided_slice %0 {offsets = [2, 0], sizes = [1, 128], strides = [1, 1]} : vector<3x128xi32> to vector<1x128xi32>
    %16 = vector.broadcast %15 : vector<1x128xi32> to vector<128x128xi32>
    %17 = arith.cmpi eq, %1, %16 : vector<128x128xi32>
    %18 = arith.extui %17 : vector<128x128xi1> to vector<128x128xi32>
    %19 = arith.sitofp %18 : vector<128x128xi32> to vector<128x128xf32>
    %20 = arith.addf %14, %19 : vector<128x128xf32>
    %c0_1 = arith.constant 0 : index
    %c0_2 = arith.constant 0 : index
    %21 = vector.load %arg2[%c0_1, %c0_2] : memref<48x128xf32, #tpu.memory_space<vmem>>, vector<48x128xf32>
    %cst_3 = arith.constant dense<0.000000e+00> : vector<48x128xf32>
    %22 = tpu.matmul %21, %20, %cst_3 {dimension_numbers = #tpu.dot_dimension_numbers<[1], [0], [0], [1], [0, 0, 1, 1], [], []>, precision = #tpu.contract_precision<fp32>} : vector<48x128xf32>, vector<128x128xf32>, vector<48x128xf32> -> vector<48x128xf32>
    %c0_4 = arith.constant 0 : index
    %c0_5 = arith.constant 0 : index
    %23 = vector.load %arg3[%c0_4, %c0_5] : memref<48x1xf32, #tpu.memory_space<vmem>>, vector<48x1xf32>
    %24 = vector.broadcast %23 : vector<48x1xf32> to vector<48x128xf32>
    %25 = arith.addf %22, %24 : vector<48x128xf32>
    %cst_6 = arith.constant 0.000000e+00 : f32
    %26 = vector.broadcast %cst_6 : f32 to vector<48x128xf32>
    %27 = arith.maximumf %25, %26 : vector<48x128xf32>
    %c0_7 = arith.constant 0 : index
    %c0_8 = arith.constant 0 : index
    %28 = vector.load %arg4[%c0_7, %c0_8] : memref<48x1xf32, #tpu.memory_space<vmem>>, vector<48x1xf32>
    %29 = vector.broadcast %28 : vector<48x1xf32> to vector<48x128xf32>
    %30 = arith.mulf %27, %29 : vector<48x128xf32>
    %c0_9 = arith.constant 0 : index
    %c0_10 = arith.constant 0 : index
    %31 = vector.load %arg5[%c0_9, %c0_10] : memref<48x1xf32, #tpu.memory_space<vmem>>, vector<48x1xf32>
    %32 = vector.broadcast %31 : vector<48x1xf32> to vector<48x128xf32>
    %33 = arith.mulf %22, %32 : vector<48x128xf32>
    %c0_11 = arith.constant 0 : index
    %c0_12 = arith.constant 0 : index
    %34 = vector.load %arg6[%c0_11, %c0_12] : memref<48x1xf32, #tpu.memory_space<vmem>>, vector<48x1xf32>
    %35 = vector.broadcast %34 : vector<48x1xf32> to vector<48x128xf32>
    %36 = arith.addf %33, %35 : vector<48x128xf32>
    %37 = arith.mulf %22, %36 : vector<48x128xf32>
    %38 = arith.addf %30, %37 : vector<48x128xf32>
    %cst_13 = arith.constant dense<0.000000e+00> : vector<128xf32>
    %39 = vector.multi_reduction <add>, %38, %cst_13 [0] : vector<48x128xf32> to vector<128xf32>
    %40 = vector.shape_cast %39 : vector<128xf32> to vector<1x128xf32>
    %c0_14 = arith.constant 0 : index
    %41 = memref.load %arg7[%c0_14] : memref<1xf32, #tpu.memory_space<smem>>
    %42 = vector.broadcast %41 : f32 to vector<1x128xf32>
    %43 = arith.addf %40, %42 : vector<1x128xf32>
    %44 = arith.negf %43 : vector<1x128xf32>
    %45 = math.exp %44 : vector<1x128xf32>
    %cst_15 = arith.constant 1.000000e+00 : f32
    %46 = vector.broadcast %cst_15 : f32 to vector<1x128xf32>
    %47 = arith.addf %46, %45 : vector<1x128xf32>
    %48 = arith.divf %46, %47 : vector<1x128xf32>
    %c0_16 = arith.constant 0 : index
    %c0_17 = arith.constant 0 : index
    %49 = vector.load %arg8[%c0_16, %c0_17] : memref<1x128xf32, #tpu.memory_space<vmem>>, vector<1x128xf32>
    tpu.vector_store %arg8[%c0_16, %c0_17], %48 {strides = array<i32>} : memref<1x128xf32, #tpu.memory_space<vmem>>, vector<1x128xf32>,
    return
  }
  func.func @transform_0(%arg0: i32) -> (i32, i32) {
    %c0_i32 = arith.constant 0 : i32
    %c0_i32_0 = arith.constant 0 : i32
    return %c0_i32, %arg0 : i32, i32
  }
  func.func @transform_1(%arg0: i32) -> (i32, i32) {
    %c0_i32 = arith.constant 0 : i32
    %c0_i32_0 = arith.constant 0 : i32
    %c0_i32_1 = arith.constant 0 : i32
    return %c0_i32, %c0_i32_0 : i32, i32
  }
  func.func @transform_2(%arg0: i32) -> (i32, i32) {
    %c0_i32 = arith.constant 0 : i32
    %c0_i32_0 = arith.constant 0 : i32
    %c0_i32_1 = arith.constant 0 : i32
    return %c0_i32, %c0_i32_0 : i32, i32
  }
  func.func @transform_3(%arg0: i32) -> (i32, i32) {
    %c0_i32 = arith.constant 0 : i32
    %c0_i32_0 = arith.constant 0 : i32
    %c0_i32_1 = arith.constant 0 : i32
    return %c0_i32, %c0_i32_0 : i32, i32
  }
  func.func @transform_4(%arg0: i32) -> (i32, i32) {
    %c0_i32 = arith.constant 0 : i32
    %c0_i32_0 = arith.constant 0 : i32
    %c0_i32_1 = arith.constant 0 : i32
    return %c0_i32, %c0_i32_0 : i32, i32
  }
  func.func @transform_5(%arg0: i32) -> (i32, i32) {
    %c0_i32 = arith.constant 0 : i32
    %c0_i32_0 = arith.constant 0 : i32
    %c0_i32_1 = arith.constant 0 : i32
    return %c0_i32, %c0_i32_0 : i32, i32
  }
  func.func @transform_6(%arg0: i32) -> i32 {
    %c0_i32 = arith.constant 0 : i32
    %c0_i32_0 = arith.constant 0 : i32
    return %c0_i32 : i32
  }
  func.func @transform_7(%arg0: i32) -> (i32, i32) {
    %c0_i32 = arith.constant 0 : i32
    %c0_i32_0 = arith.constant 0 : i32
    return %c0_i32, %arg0 : i32, i32
  }
}

</mosaic_0001>

<bundles_post_ra>
// kernel: tpu_custom_call.1
= control target key start
LH: loop header
LB: loop body
LE: loop exit
PB: predicated region body
PF: predicated region fallthrough
CT: control target
= control target key end

     0   :  { %v29_v1 = vlaneseq  ;;  %v1096_v4 = vmov 0   ;;  %s1674_s0 = inlined_call_operand.vmem [shape: s32[3,128], index: 0, kind: input, shape index: {}]   ;;  %s1675_s1 = inlined_call_operand.vmem [shape: f32[48,128], index: 1, kind: input, shape index: {}]   ;;  %s1676_s2 = inlined_call_operand.vmem [shape: f32[48,1], index: 2, kind: input, shape index: {}]   ;;  %s1677_s3 = inlined_call_operand.vmem [shape: f32[48,1], index: 3, kind: input, shape index: {}]   ;;  %s1678_s4 = inlined_call_operand.vmem [shape: f32[48,1], index: 4, kind: input, shape index: {}]   ;;  %s1679_s5 = inlined_call_operand.vmem [shape: f32[48,1], index: 5, kind: input, shape index: {}]   ;;  %s1680_s6 = inlined_call_operand.<no memory space> [shape: f32[1], index: 6, kind: input, shape index: {}]   ;;  %s1681_s7 = inlined_call_operand.hbm [shape: f32[1,128], index: 7, kind: output, shape index: {}]  }
   0x1   :  { %v28_v0 = vld [vmem:[%s1674_s0] sm:$0x7]  ;;  %v745_v2 = vld [vmem:[%s1676_s2 + $0x10] sm:$0xff]  ;;  %1064 = vset.pattern.permute.xlu1 %v1096_v4  ;;  %1063 = vset.pattern.permute.xlu0 %v1096_v4 }
   0x2   :  { %v743_v3 = vld [vmem:[%s1676_s2] sm:$0xff] }
   0x3   :  { %13 = vsyncpa [#allocation4], 0  ;;  %v1148_v5 = vshrl.u32 %v29_v1, 7  ;;  %v1150_v6 = vperm.slane %v28_v0, 0  ;;  %v1152_v7 = vperm.slane %v28_v0, 1  ;;  %v1154_v8 = vperm.slane %v28_v0, 2  ;;  %761 = vperm.xlu1 %1064, %v745_v2   ;;  %751 = vperm.xlu0 %1063, %v743_v3  }
   0x4   :  { %1065 = vset.pattern.permute.xlu2 %v1096_v4  ;;  %v1097_v17 = vmov 0.0   ;;  %v746_v23 = vld [vmem:[%s1676_s2 + $0x18] sm:$0xff]  ;;  %v744_v24 = vld [vmem:[%s1676_s2 + $0x8] sm:$0xff]  ;;  %v791_v0 = vld [vmem:[%s1677_s3] sm:$0xff]  ;;  %s1098_s10 = smov [#allocation3]  }
   0x5   :  { %v45_v9 = vadd.s32 120, %v1148_v5  ;;  %v44_v10 = vadd.s32 112, %v1148_v5  ;;  %v43_v11 = vadd.s32 104, %v1148_v5  ;;  %v42_v12 = vadd.s32 96, %v1148_v5  ;;  %v792_v63 = vld [vmem:[%s1677_s3 + $0x8] sm:$0xff]  ;;  %s968_s11 = sshll.u32 %s1098_s10, 4  ;;  %s969_s11 = int_to_ptr.vmem [resolvable:$true] %s968_s11 }
   0x6   :  { %v41_v13 = vadd.s32 88, %v1148_v5  ;;  %v1162_v14 = vadd.s32 80, %v1148_v5  ;;  %v1165_v15 = vadd.s32 72, %v1148_v5  ;;  %v1168_v16 = vadd.s32 64, %v1148_v5 }
   0x7   :  { %vm62_vm0 = vcmp.eq.s32.totalorder %v45_v9, %v1150_v6  ;;  %vm127_vm1 = vcmp.eq.s32.totalorder %v45_v9, %v1152_v7  ;;  %vm192_vm2 = vcmp.eq.s32.totalorder %v45_v9, %v1154_v8  ;;  %vm61_vm3 = vcmp.eq.s32.totalorder %v44_v10, %v1150_v6 }
   0x8   :  { %v994_v18 = vsel %vm62_vm0, 1.0, %v1097_v17  ;;  %v1010_v19 = vsel %vm127_vm1, 1.0, %v1097_v17  ;;  %v1026_v20 = vsel %vm192_vm2, 1.0, %v1097_v17  ;;  %v993_v21 = vsel %vm61_vm3, 1.0, %v1097_v17 }
   0x9   :  { %v175_v22 = vadd.f32 %v1010_v19, %v994_v18  ;;  %vm126_vm4 = vcmp.eq.s32.totalorder %v44_v10, %v1152_v7  ;;  %vm191_vm5 = vcmp.eq.s32.totalorder %v44_v10, %v1154_v8  ;;  %vm60_vm6 = vcmp.eq.s32.totalorder %v43_v11, %v1150_v6 }
   0xa   :  { %v1009_v25 = vsel %vm126_vm4, 1.0, %v1097_v17  ;;  %v1025_v26 = vsel %vm191_vm5, 1.0, %v1097_v17  ;;  %v992_v27 = vsel %vm60_vm6, 1.0, %v1097_v17  ;;  %vm125_vm7 = vcmp.eq.s32.totalorder %v43_v11, %v1152_v7 }
   0xb   :  { %v240_v28 = vadd.f32 %v1026_v20, %v175_v22  ;;  %v174_v29 = vadd.f32 %v1009_v25, %v993_v21  ;;  %v1008_v30 = vsel %vm125_vm7, 1.0, %v1097_v17  ;;  %vm190_vm8 = vcmp.eq.s32.totalorder %v43_v11, %v1154_v8  ;;  %766 = vperm.xlu1 %1064, %v746_v23   ;;  %756 = vperm.xlu0 %1063, %v744_v24  }
   0xc   :  { %v173_v31 = vadd.f32 %v1008_v30, %v992_v27  ;;  %v1024_v32 = vsel %vm190_vm8, 1.0, %v1097_v17  ;;  %vm59_vm9 = vcmp.eq.s32.totalorder %v42_v12, %v1150_v6  ;;  %vm124_vm10 = vcmp.eq.s32.totalorder %v42_v12, %v1152_v7 }
   0xd   :  { %v1196_v33 = vand.u32 4294901760, %v240_v28  ;;  %v239_v34 = vadd.f32 %v1025_v26, %v174_v29  ;;  %v991_v35 = vsel %vm59_vm9, 1.0, %v1097_v17  ;;  %v1007_v36 = vsel %vm124_vm10, 1.0, %v1097_v17 }
   0xe   :  { %v238_v37 = vadd.f32 %v1024_v32, %v173_v31  ;;  %v172_v38 = vadd.f32 %v1007_v36, %v991_v35  ;;  %vm189_vm11 = vcmp.eq.s32.totalorder %v42_v12, %v1154_v8  ;;  %vm58_vm12 = vcmp.eq.s32.totalorder %v41_v13, %v1150_v6 }
   0xf   :  { %248 = vmatpush.msra.mxu0 %v1196_v33  ;;  %v1203_v39 = vand.u32 4294901760, %v239_v34  ;;  %v329_v40 = vsub.f32 %v240_v28, %v1196_v33  ;;  %529 = vmatpush.msra.mxu3 %v1196_v33  ;;  %v1023_v41 = vsel %vm189_vm11, 1.0, %v1097_v17  ;;  %v990_v42 = vsel %vm58_vm12, 1.0, %v1097_v17 }
  0x10   :  { %v1209_v43 = vand.u32 4294901760, %v238_v37  ;;  %v237_v44 = vadd.f32 %v1023_v41, %v172_v38  ;;  %vm123_vm13 = vcmp.eq.s32.totalorder %v41_v13, %v1152_v7  ;;  %vm188_vm14 = vcmp.eq.s32.totalorder %v41_v13, %v1154_v8 }
  0x11   :  { %250 = vmatpush.msra.mxu0 %v1203_v39  ;;  %451 = vmatpush.msra.mxu2 %v329_v40  ;;  %v335_v45 = vsub.f32 %v239_v34, %v1203_v39  ;;  %v1006_v46 = vsel %vm123_vm13, 1.0, %v1097_v17  ;;  %v1022_v47 = vsel %vm188_vm14, 1.0, %v1097_v17  ;;  %v1217_v48 = vand.u32 4294901760, %v329_v40 }
  0x12   :  { %v1219_v49 = vand.u32 4294901760, %v237_v44  ;;  %v341_v50 = vsub.f32 %v238_v37, %v1209_v43  ;;  %531 = vmatpush.msra.mxu3 %v1203_v39  ;;  %v171_v51 = vadd.f32 %v1006_v46, %v990_v42  ;;  %vm57_vm15 = vcmp.eq.s32.totalorder %v1162_v14, %v1150_v6 }
  0x13   :  { %252 = vmatpush.msra.mxu0 %v1209_v43  ;;  %454 = vmatpush.msra.mxu2 %v335_v45  ;;  %v331_v52 = vsub.f32 %v329_v40, %v1217_v48  ;;  %v989_v53 = vsel %vm57_vm15, 1.0, %v1097_v17  ;;  %vm122_vm0 = vcmp.eq.s32.totalorder %v1162_v14, %v1152_v7  ;;  %vm187_vm1 = vcmp.eq.s32.totalorder %v1162_v14, %v1154_v8 }
  0x14   :  { %v236_v54 = vadd.f32 %v1022_v47, %v171_v51  ;;  %v1233_v55 = vsub.f32 %v237_v44, %v1219_v49  ;;  %533 = vmatpush.msra.mxu3 %v1209_v43  ;;  %v1005_v56 = vsel %vm122_vm0, 1.0, %v1097_v17  ;;  %v1021_v57 = vsel %vm187_vm1, 1.0, %v1097_v17  ;;  %804 = vperm.xlu1 %1064, %v792_v63   ;;  %v834_v51 = vld [vmem:[%s1678_s4 + $0x8] sm:$0xff] }
  0x15   :  { %254 = vmatpush.msra.mxu0 %v1219_v49  ;;  %457 = vmatpush.msra.mxu2 %v341_v50  ;;  %v332_v58 = vand.u32 4294901760, %v331_v52  ;;  %v170_v59 = vadd.f32 %v1005_v56, %v989_v53  ;;  %v1239_v60 = vand.u32 4294901760, %v335_v45  ;;  %vm56_vm2 = vcmp.eq.s32.totalorder %v1165_v15, %v1150_v6 }
  0x16   :  { %v1243_v61 = vand.u32 4294901760, %v236_v54  ;;  %535 = vmatpush.msra.mxu3 %v1219_v49  ;;  %v988_v62 = vsel %vm56_vm2, 1.0, %v1097_v17  ;;  %vm121_vm3 = vcmp.eq.s32.totalorder %v1165_v15, %v1152_v7  ;;  %vm186_vm4 = vcmp.eq.s32.totalorder %v1165_v15, %v1154_v8  ;;  %799 = vperm.xlu0 %1063, %v791_v0  }
  0x17   :  { %333 = vmatpush.msra.mxu1 %v332_v58  ;;  %460 = vmatpush.msra.mxu2 %v1233_v55  ;;  %v235_v1 = vadd.f32 %v1021_v57, %v170_v59  ;;  %v337_v2 = vsub.f32 %v335_v45, %v1239_v60  ;;  %v1004_v3 = vsel %vm121_vm3, 1.0, %v1097_v17  ;;  %v1020_v4 = vsel %vm186_vm4, 1.0, %v1097_v17 }
  0x18   :  { %256 = vmatpush.msra.mxu0 %v1243_v61  ;;  %v353_v9 = vsub.f32 %v236_v54, %v1243_v61  ;;  %v169_v10 = vadd.f32 %v1004_v3, %v988_v62  ;;  %v1263_v11 = vand.u32 4294901760, %v341_v50  ;;  %537 = vmatpush.msra.mxu3 %v1243_v61  ;;  %vm55_vm5 = vcmp.eq.s32.totalorder %v1168_v16, %v1150_v6 }
  0x19   :  { %v1268_v12 = vand.u32 4294901760, %v235_v1  ;;  %v338_v13 = vand.u32 4294901760, %v337_v2  ;;  %v987_v14 = vsel %vm55_vm5, 1.0, %v1097_v17  ;;  %vm120_vm6 = vcmp.eq.s32.totalorder %v1168_v16, %v1152_v7 }
  0x1a   :  { %463 = vmatpush.msra.mxu2 %v353_v9  ;;  %v234_v15 = vadd.f32 %v1020_v4, %v169_v10  ;;  %v343_v18 = vsub.f32 %v341_v50, %v1263_v11  ;;  %v1003_v19 = vsel %vm120_vm6, 1.0, %v1097_v17  ;;  %vm185_vm7 = vcmp.eq.s32.totalorder %v1168_v16, %v1154_v8  ;;  %v835_v50 = vld [vmem:[%s1678_s4 + $0x10] sm:$0xff] }
  0x1b   :  { %258 = vmatpush.msra.mxu0 %v1268_v12  ;;  %339 = vmatpush.msra.mxu1 %v338_v13  ;;  %v359_v20 = vsub.f32 %v235_v1, %v1268_v12  ;;  %v168_v21 = vadd.f32 %v1003_v19, %v987_v14  ;;  %v1019_v22 = vsel %vm185_vm7, 1.0, %v1097_v17  ;;  %v1281_v23 = vand.u32 4294901760, %v1233_v55 }
  0x1c   :  { %v1283_v24 = vand.u32 4294901760, %v234_v15  ;;  %v344_v25 = vand.u32 4294901760, %v343_v18  ;;  %539 = vmatpush.msra.mxu3 %v1268_v12  ;;  %v37_v26 = vadd.s32 56, %v1148_v5  ;;  %v1287_v27 = vand.u32 4294901760, %v353_v9  ;;  %851 = vperm.xlu1 %1064, %v835_v50  }
  0x1d   :  { %466 = vmatpush.msra.mxu2 %v359_v20  ;;  %v233_v16 = vadd.f32 %v1019_v22, %v168_v21  ;;  %v349_v28 = vsub.f32 %v1233_v55, %v1281_v23  ;;  %v36_v29 = vadd.s32 48, %v1148_v5  ;;  %v1292_v30 = vand.u32 4294901760, %v359_v20  ;;  %v747_v55 = vld [vmem:[%s1676_s2 + $0x20] sm:$0xff] }
  0x1e   :  { %260 = vmatpush.msra.mxu0 %v1283_v24  ;;  %345 = vmatpush.msra.mxu1 %v344_v25  ;;  %v1296_v31 = vsub.f32 %v234_v15, %v1283_v24  ;;  %vm54_vm8 = vcmp.eq.s32.totalorder %v37_v26, %v1150_v6  ;;  %vm119_vm9 = vcmp.eq.s32.totalorder %v37_v26, %v1152_v7  ;;  %v35_v32 = vadd.s32 40, %v1148_v5 }
  0x1f   :  { %v1301_v34 = vand.u32 4294901760, %v233_v16  ;;  %v350_v35 = vand.u32 4294901760, %v349_v28  ;;  %v986_v36 = vsel %vm54_vm8, 1.0, %v1097_v17  ;;  %v1002_v37 = vsel %vm119_vm9, 1.0, %v1097_v17  ;;  %541 = vmatpush.msra.mxu3 %v1283_v24  ;;  %846 = vperm.xlu0 %1063, %v834_v51  }
  0x20   :  { %469 = vmatpush.msra.mxu2 %v1296_v31  ;;  %v167_v38 = vadd.f32 %v1002_v37, %v986_v36  ;;  %vm184_vm10 = vcmp.eq.s32.totalorder %v37_v26, %v1154_v8  ;;  %v355_v40 = vsub.f32 %v353_v9, %v1287_v27  ;;  %vm53_vm11 = vcmp.eq.s32.totalorder %v36_v29, %v1150_v6  ;;  %v748_v37 = vld [vmem:[%s1676_s2 + $0x28] sm:$0xff] }
  0x21   :  { %262 = vmatpush.msra.mxu0 %v1301_v34  ;;  %351 = vmatpush.msra.mxu1 %v350_v35  ;;  %v1018_v41 = vsel %vm184_vm10, 1.0, %v1097_v17  ;;  %v1313_v42 = vsub.f32 %v233_v16, %v1301_v34  ;;  %v985_v44 = vsel %vm53_vm11, 1.0, %v1097_v17  ;;  %vm118_vm12 = vcmp.eq.s32.totalorder %v36_v29, %v1152_v7  ;;  %v836_v16 = vld [vmem:[%s1678_s4 + $0x18] sm:$0xff] }
  0x22   :  { %v232_v45 = vadd.f32 %v1018_v41, %v167_v38  ;;  %v356_v46 = vand.u32 4294901760, %v355_v40  ;;  %v1001_v47 = vsel %vm118_vm12, 1.0, %v1097_v17  ;;  %vm183_vm13 = vcmp.eq.s32.totalorder %v36_v29, %v1154_v8  ;;  %543 = vmatpush.msra.mxu3 %v1301_v34  ;;  %771 = vperm.xlu2 %1065, %v747_v55   ;;  %v876_v29 = vld [vmem:[%s1679_s5 + $0x8] sm:$0xff] }
  0x23   :  { %472 = vmatpush.msra.mxu2 %v1313_v42  ;;  %v166_v52 = vadd.f32 %v1001_v47, %v985_v44  ;;  %v1017_v53 = vsel %vm183_vm13, 1.0, %v1097_v17  ;;  %v361_v54 = vsub.f32 %v359_v20, %v1292_v30  ;;  %vm52_vm14 = vcmp.eq.s32.totalorder %v35_v32, %v1150_v6 }
  0x24   :  { %v1333_v56 = vand.u32 4294901760, %v232_v45  ;;  %357 = vmatpush.msra.mxu1 %v356_v46  ;;  %v984_v57 = vsel %vm52_vm14, 1.0, %v1097_v17  ;;  %vm117_vm15 = vcmp.eq.s32.totalorder %v35_v32, %v1152_v7  ;;  %vm182_vm0 = vcmp.eq.s32.totalorder %v35_v32, %v1154_v8  ;;  %856 = vperm.xlu1 %1064, %v836_v16  }
  0x25   :  { %v231_v58 = vadd.f32 %v1017_v53, %v166_v52  ;;  %v362_v59 = vand.u32 4294901760, %v361_v54  ;;  %v1000_v62 = vsel %vm117_vm15, 1.0, %v1097_v17  ;;  %v1016_v63 = vsel %vm182_vm0, 1.0, %v1097_v17 }
  0x26   :  { %264 = vmatpush.msra.mxu0 %v1333_v56  ;;  %v1342_v0 = vsub.f32 %v232_v45, %v1333_v56  ;;  %v165_v1 = vadd.f32 %v1000_v62, %v984_v57  ;;  %v1345_v2 = vand.u32 4294901760, %v1296_v31  ;;  %545 = vmatpush.msra.mxu3 %v1333_v56  ;;  %v34_v3 = vadd.s32 32, %v1148_v5 }
  0x27   :  { %v1349_v4 = vand.u32 4294901760, %v231_v58  ;;  %363 = vmatpush.msra.mxu1 %v362_v59  ;;  %v1352_v9 = vand.u32 4294901760, %v1313_v42  ;;  %v33_v10 = vadd.s32 24, %v1148_v5  ;;  %v32_v13 = vadd.s32 16, %v1148_v5  ;;  %888 = vperm.xlu0 %1063, %v876_v29  }
  0x28   :  { %475 = vmatpush.msra.mxu2 %v1342_v0  ;;  %v230_v14 = vadd.f32 %v1016_v63, %v165_v1  ;;  %v367_v15 = vsub.f32 %v1296_v31, %v1345_v2  ;;  %vm51_vm1 = vcmp.eq.s32.totalorder %v34_v3, %v1150_v6  ;;  %vm116_vm2 = vcmp.eq.s32.totalorder %v34_v3, %v1152_v7 }
  0x29   :  { %266 = vmatpush.msra.mxu0 %v1349_v4  ;;  %v1363_v18 = vsub.f32 %v231_v58, %v1349_v4  ;;  %v983_v19 = vsel %vm51_vm1, 1.0, %v1097_v17  ;;  %v999_v20 = vsel %vm116_vm2, 1.0, %v1097_v17  ;;  %vm181_vm3 = vcmp.eq.s32.totalorder %v34_v3, %v1154_v8  ;;  %547 = vmatpush.msra.mxu3 %v1349_v4 }
  0x2a   :  { %v1369_v21 = vand.u32 4294901760, %v230_v14  ;;  %v368_v22 = vand.u32 4294901760, %v367_v15  ;;  %v164_v25 = vadd.f32 %v999_v20, %v983_v19  ;;  %v1015_v26 = vsel %vm181_vm3, 1.0, %v1097_v17  ;;  %776 = vperm.xlu2 %1065, %v748_v37  }
  0x2b   :  { %478 = vmatpush.msra.mxu2 %v1363_v18  ;;  %v373_v28 = vsub.f32 %v1313_v42, %v1352_v9  ;;  %vm50_vm4 = vcmp.eq.s32.totalorder %v33_v10, %v1150_v6  ;;  %vm115_vm5 = vcmp.eq.s32.totalorder %v33_v10, %v1152_v7  ;;  %vm180_vm6 = vcmp.eq.s32.totalorder %v33_v10, %v1154_v8 }
  0x2c   :  { %268 = vmatpush.msra.mxu0 %v1369_v21  ;;  %369 = vmatpush.msra.mxu1 %v368_v22  ;;  %v229_v31 = vadd.f32 %v1015_v26, %v164_v25  ;;  %v1386_v32 = vsub.f32 %v230_v14, %v1369_v21  ;;  %v982_v35 = vsel %vm50_vm4, 1.0, %v1097_v17  ;;  %v998_v36 = vsel %vm115_vm5, 1.0, %v1097_v17  ;;  %v241_v22 = vld [vmem:[%s1675_s1] sm:$0xff] }
  0x2d   :  { %v374_v38 = vand.u32 4294901760, %v373_v28  ;;  %v163_v40 = vadd.f32 %v998_v36, %v982_v35  ;;  %v1014_v41 = vsel %vm180_vm6, 1.0, %v1097_v17  ;;  %v1395_v42 = vand.u32 4294901760, %v1342_v0  ;;  %549 = vmatpush.msra.mxu3 %v1369_v21  ;;  %v833_v25 = vld [vmem:[%s1678_s4] sm:$0xff] }
  0x2e   :  { %v1398_v44 = vand.u32 4294901760, %v229_v31  ;;  %481 = vmatpush.msra.mxu2 %v1386_v32  ;;  %vm49_vm7 = vcmp.eq.s32.totalorder %v32_v13, %v1150_v6  ;;  %vm114_vm8 = vcmp.eq.s32.totalorder %v32_v13, %v1152_v7  ;;  %vm179_vm9 = vcmp.eq.s32.totalorder %v32_v13, %v1154_v8 }
  0x2f   :  { %375 = vmatpush.msra.mxu1 %v374_v38  ;;  %v228_v45 = vadd.f32 %v1014_v41, %v163_v40  ;;  %v379_v46 = vsub.f32 %v1342_v0, %v1395_v42  ;;  %v981_v47 = vsel %vm49_vm7, 1.0, %v1097_v17  ;;  %v997_v50 = vsel %vm114_vm8, 1.0, %v1097_v17  ;;  %v837_v0 = vld [vmem:[%s1678_s4 + $0x20] sm:$0xff] }
  0x30   :  { %270 = vmatpush.msra.mxu0 %v1398_v44  ;;  %v1410_v51 = vsub.f32 %v229_v31, %v1398_v44  ;;  %v162_v52 = vadd.f32 %v997_v50, %v981_v47  ;;  %v1013_v53 = vsel %vm179_vm9, 1.0, %v1097_v17  ;;  %v1414_v54 = vand.u32 4294901760, %v1363_v18  ;;  %551 = vmatpush.msra.mxu3 %v1398_v44 }
  0x31   :  { %v1417_v55 = vand.u32 4294901760, %v228_v45  ;;  %v380_v57 = vand.u32 4294901760, %v379_v46  ;;  %v31_v58 = vadd.s32 8, %v1148_v5  ;;  %v1421_v59 = vand.u32 4294901760, %v1386_v32  ;;  %861 = vperm.xlu1 %1064, %v837_v0  }
  0x32   :  { %484 = vmatpush.msra.mxu2 %v1410_v51  ;;  %v227_v62 = vadd.f32 %v1013_v53, %v162_v52  ;;  %v385_v63 = vsub.f32 %v1363_v18, %v1414_v54  ;;  %vm47_vm10 = vcmp.eq.s32.totalorder %v1148_v5, %v1150_v6  ;;  %vm112_vm11 = vcmp.eq.s32.totalorder %v1148_v5, %v1152_v7  ;;  %v793_v18 = vld [vmem:[%s1677_s3 + $0x10] sm:$0xff] }
  0x33   :  { %272 = vmatpush.msra.mxu0 %v1417_v55  ;;  %381 = vmatpush.msra.mxu1 %v380_v57  ;;  %v401_v1 = vsub.f32 %v228_v45, %v1417_v55  ;;  %vm48_vm12 = vcmp.eq.s32.totalorder %v31_v58, %v1150_v6  ;;  %vm113_vm13 = vcmp.eq.s32.totalorder %v31_v58, %v1152_v7  ;;  %v979_v3 = vsel %vm47_vm10, 1.0, %v1097_v17  ;;  %v242_v7 = vld [vmem:[%s1675_s1 + $0x8] sm:$0xff] }
  0x34   :  { %v1438_v10 = vand.u32 4294901760, %v227_v62  ;;  %v386_v13 = vand.u32 4294901760, %v385_v63  ;;  %v980_v14 = vsel %vm48_vm12, 1.0, %v1097_v17  ;;  %v996_v15 = vsel %vm113_vm13, 1.0, %v1097_v17  ;;  %553 = vmatpush.msra.mxu3 %v1417_v55  ;;  %809 = vperm.xlu0 %1063, %v793_v18  }
  0x35   :  { %487 = vmatpush.msra.mxu2 %v401_v1  ;;  %v161_v19 = vadd.f32 %v996_v15, %v980_v14  ;;  %vm178_vm14 = vcmp.eq.s32.totalorder %v31_v58, %v1154_v8  ;;  %v391_v6 = vsub.f32 %v1386_v32, %v1421_v59  ;;  %v995_v20 = vsel %vm112_vm11, 1.0, %v1097_v17  ;;  %841 = vperm.xlu2 %1065, %v833_v25  }
  0x36   :  { %274 = vmatpush.msra.mxu0 %v1438_v10  ;;  %387 = vmatpush.msra.mxu1 %v386_v13  ;;  %v1012_v26 = vsel %vm178_vm14, 1.0, %v1097_v17  ;;  %v407_v16 = vsub.f32 %v227_v62, %v1438_v10  ;;  %v160_v28 = vadd.f32 %v995_v20, %v979_v3  ;;  %vm177_vm15 = vcmp.eq.s32.totalorder %v1148_v5, %v1154_v8 }
  0x37   :  { %v226_v29 = vadd.f32 %v1012_v26, %v161_v19  ;;  %v392_v31 = vand.u32 4294901760, %v391_v6  ;;  %v1011_v32 = vsel %vm177_vm15, 1.0, %v1097_v17  ;;  %v1469_v35 = vand.u32 4294901760, %v1410_v51  ;;  %555 = vmatpush.msra.mxu3 %v1438_v10  ;;  %v244_v26 = vld [vmem:[%s1675_s1 + $0x18] sm:$0xff] }
  0x38   :  { %490 = vmatpush.msra.mxu2 %v407_v16  ;;  %v225_v36 = vadd.f32 %v1011_v32, %v160_v28  ;;  %v1472_v37 = vand.u32 4294901760, %v241_v22  ;;  %v1474_v38 = vand.u32 4294901760, %v401_v1  ;;  %v1476_v5 = vand.u32 4294901760, %v407_v16 }
  0x39   :  { %v1478_v8 = vand.u32 4294901760, %v226_v29  ;;  %393 = vmatpush.msra.mxu1 %v392_v31  ;;  %v397_v17 = vsub.f32 %v1410_v51, %v1469_v35  ;;  %v1482_v40 = vand.u32 4294901760, %v242_v7  ;;  %v243_v51 = vld [vmem:[%s1675_s1 + $0x10] sm:$0xff]  ;;  %v1519_v28 = vand.u32 4294901760, %v244_v26 }
  0x3a   :  { %v1484_v41 = vand.u32 4294901760, %v225_v36  ;;  %v280_v45 = vsub.f32 %v241_v22, %v1472_v37  ;;  %v403_v46 = vsub.f32 %v401_v1, %v1474_v38  ;;  %v409_v47 = vsub.f32 %v407_v16, %v1476_v5 }
  0x3b   :  { %276 = vmatpush.msra.mxu0 %v1478_v8  ;;  %v398_v50 = vand.u32 4294901760, %v397_v17  ;;  %v413_v52 = vsub.f32 %v226_v29, %v1478_v8  ;;  %557 = vmatpush.msra.mxu3 %v1478_v8  ;;  %v288_v53 = vsub.f32 %v242_v7, %v1482_v40  ;;  %v1503_v14 = vand.u32 4294901760, %v243_v51 }
  0x3c   :  { %v281_v57 = vand.u32 4294901760, %v280_v45  ;;  %v404_v58 = vand.u32 4294901760, %v403_v46  ;;  %v419_v62 = vsub.f32 %v225_v36, %v1484_v41  ;;  %v410_v63 = vand.u32 4294901760, %v409_v47 }
  0x3d   :  { %278 = vmatpush.msra.mxu0 %v1484_v41  ;;  %399 = vmatpush.msra.mxu1 %v398_v50  ;;  %v1498_v0 = vand.u32 4294901760, %v413_v52  ;;  %v289_v13 = vand.u32 4294901760, %v288_v53  ;;  %v296_v25 = vsub.f32 %v243_v51, %v1503_v14  ;;  %v304_v7 = vsub.f32 %v244_v26, %v1519_v28 }
  0x3e   :  { %493 = vmatpush.msra.mxu2 %v413_v52  ;;  %v282_v1 = vsub.f32 %v280_v45, %v281_v57  ;;  %559 = vmatpush.msra.mxu3 %v1484_v41  ;;  %v1501_v3 = vand.u32 4294901760, %v419_v62 }
  0x3f   :  { %405 = vmatpush.msra.mxu1 %v404_v58  ;;  %563 = vmatmul.f32.vlgmr.msra.gmra.mxu3 %v281_v57  ;;  %v415_v15 = vsub.f32 %v413_v52, %v1498_v0  ;;  %v290_v22 = vsub.f32 %v288_v53, %v289_v13 }
  0x40   :  { %v283_v18 = vand.u32 4294901760, %v282_v1  ;;  %496 = vmatpush.msra.mxu2 %v419_v62  ;;  %600 = vmatpush.msrb.mxu0 %v1217_v48  ;;  %v421_v19 = vsub.f32 %v419_v62, %v1501_v3 }
  0x41   :  { %499 = vmatmul.f32.vlgmr.msra.gmra.mxu2 %v280_v45  ;;  %411 = vmatpush.msra.mxu1 %v410_v63  ;;  %v416_v6 = vand.u32 4294901760, %v415_v15  ;;  %v291_v16 = vand.u32 4294901760, %v290_v22 }
  0x42   :  { %284 = vmatmul.f32.vlgmr.msra.gmra.mxu0 %v283_v18  ;;  %1028 = vmatpush.msrb.mxu2 %v1217_v48  ;;  %v422_v20 = vand.u32 4294901760, %v421_v19  ;;  %v297_v48 = vand.u32 4294901760, %v296_v25 }
  0x43   :  { %417 = vmatpush.msra.mxu1 %v416_v6  ;;  %1044 = vmatpush.msrb.mxu3 %v1196_v33 }
  0x44   :  { %604 = vmatpush.msrb.mxu0 %v1239_v60  ;;  %1029 = vmatpush.msrb.mxu2 %v1239_v60  ;;  %v298_v60 = vsub.f32 %v296_v25, %v297_v48 }
  0x45   :  { %423 = vmatpush.msra.mxu1 %v422_v20  ;;  %1045 = vmatpush.msrb.mxu3 %v1203_v39 }
  0x46   :  { %425 = vmatmul.f32.vlgmr.msra.gmra.mxu1 %v1472_v37  ;;  %608 = vmatpush.msrb.mxu0 %v1263_v11 }
  0x47   :  { %687 = vmatpush.msrb.mxu1 %v1196_v33  ;;  %569 = vmatmul.f32.gmra.mxu3 %v289_v13  ;;  %v245_v33 = vld [vmem:[%s1675_s1 + $0x20] sm:$0xff] }
  0x48   :  { %1030 = vmatpush.msrb.mxu2 %v1263_v11  ;;  %1046 = vmatpush.msrb.mxu3 %v1209_v43  ;;  %v1538_v11 = vand.u32 4294901760, %v245_v33 }
  0x49   :  { %504 = vmatmul.f32.gmra.mxu2 %v288_v53  ;;  %689 = vmatpush.msrb.mxu1 %v1203_v39  ;;  %v299_v39 = vand.u32 4294901760, %v298_v60 }
  0x4a   :  { %292 = vmatmul.f32.gmra.mxu0 %v291_v16  ;;  %1031 = vmatpush.msrb.mxu2 %v1281_v23 }
  0x4b   :  { %691 = vmatpush.msrb.mxu1 %v1209_v43  ;;  %612 = vmatpush.msrb.mxu0 %v1281_v23  ;;  %v305_v43 = vand.u32 4294901760, %v304_v7  ;;  %v312_v23 = vsub.f32 %v245_v33, %v1538_v11 }
  0x4c   :  { %1047 = vmatpush.msrb.mxu3 %v1219_v49  ;;  %1032 = vmatpush.msrb.mxu2 %v1287_v27 }
  0x4d   :  { %693 = vmatpush.msrb.mxu1 %v1219_v49  ;;  %616 = vmatpush.msrb.mxu0 %v1287_v27  ;;  %v306_v49 = vsub.f32 %v304_v7, %v305_v43  ;;  %v246_v27 = vld [vmem:[%s1675_s1 + $0x28] sm:$0xff] }
  0x4e   :  { %429 = vmatmul.f32.gmra.mxu1 %v1482_v40  ;;  %1048 = vmatpush.msrb.mxu3 %v1243_v61  ;;  %v1562_v29 = vand.u32 4294901760, %v246_v27 }
  0x4f   :  { %575 = vmatmul.f32.gmra.mxu3 %v297_v48  ;;  %695 = vmatpush.msrb.mxu1 %v1243_v61  ;;  %v838_v61 = vld [vmem:[%s1678_s4 + $0x28] sm:$0xff] }
  0x50   :  { %620 = vmatpush.msrb.mxu0 %v1292_v30  ;;  %1033 = vmatpush.msrb.mxu2 %v1292_v30  ;;  %v307_v30 = vand.u32 4294901760, %v306_v49  ;;  %v320_v31 = vsub.f32 %v246_v27, %v1562_v29 }
  0x51   :  { %509 = vmatmul.f32.gmra.mxu2 %v296_v25  ;;  %697 = vmatpush.msrb.mxu1 %v1268_v12 }
  0x52   :  { %300 = vmatmul.f32.gmra.mxu0 %v299_v39  ;;  %1049 = vmatpush.msrb.mxu3 %v1268_v12  ;;  %v794_v12 = vld [vmem:[%s1677_s3 + $0x18] sm:$0xff] }
  0x53   :  { %624 = vmatpush.msrb.mxu0 %v1345_v2  ;;  %1034 = vmatpush.msrb.mxu2 %v1345_v2  ;;  %v313_v2 = vand.u32 4294901760, %v312_v23 }
  0x54   :  { %699 = vmatpush.msrb.mxu1 %v1283_v24  ;;  %1050 = vmatpush.msrb.mxu3 %v1283_v24  ;;  %v875_v24 = vld [vmem:[%s1679_s5] sm:$0xff] }
  0x55   :  { %628 = vmatpush.msrb.mxu0 %v1352_v9  ;;  %1035 = vmatpush.msrb.mxu2 %v1352_v9  ;;  %v314_v9 = vsub.f32 %v312_v23, %v313_v2 }
  0x56   :  { %433 = vmatmul.f32.gmra.mxu1 %v1503_v14  ;;  %866 = vperm.xlu1 %1064, %v838_v61  }
  0x57   :  { %581 = vmatmul.f32.gmra.mxu3 %v305_v43  ;;  %814 = vperm.xlu0 %1063, %v794_v12   ;;  %v315_v32 = vand.u32 4294901760, %v314_v9 }
  0x58   :  { %701 = vmatpush.msrb.mxu1 %v1301_v34  ;;  %1051 = vmatpush.msrb.mxu3 %v1301_v34  ;;  %v880_v34 = vld [vmem:[%s1679_s5 + $0x28] sm:$0xff] }
  0x59   :  { %514 = vmatmul.f32.gmra.mxu2 %v304_v7  ;;  %632 = vmatpush.msrb.mxu0 %v1395_v42 }
  0x5a   :  { %308 = vmatmul.f32.gmra.mxu0 %v307_v30  ;;  %1036 = vmatpush.msrb.mxu2 %v1395_v42  ;;  %v795_v42 = vld [vmem:[%s1677_s3 + $0x20] sm:$0xff] }
  0x5b   :  { %883 = vperm.xlu2 %1065, %v875_v24   ;;  %703 = vmatpush.msrb.mxu1 %v1333_v56 }
  0x5c   :  { %1052 = vmatpush.msrb.mxu3 %v1333_v56  ;;  %636 = vmatpush.msrb.mxu0 %v1414_v54  ;;  %v321_v56 = vand.u32 4294901760, %v320_v31 }
  0x5d   :  { %1037 = vmatpush.msrb.mxu2 %v1414_v54  ;;  %705 = vmatpush.msrb.mxu1 %v1349_v4  ;;  %v877_v54 = vld [vmem:[%s1679_s5 + $0x10] sm:$0xff] }
  0x5e   :  { %437 = vmatmul.f32.gmra.mxu1 %v1519_v28  ;;  %1053 = vmatpush.msrb.mxu3 %v1349_v4  ;;  %v322_v4 = vsub.f32 %v320_v31, %v321_v56 }
  0x5f   :  { %587 = vmatmul.f32.gmra.mxu3 %v313_v2  ;;  %640 = vmatpush.msrb.mxu0 %v1421_v59 }
  0x60   :  { %1038 = vmatpush.msrb.mxu2 %v1421_v59  ;;  %908 = vperm.xlu1 %1064, %v880_v34   ;;  %v323_v59 = vand.u32 4294901760, %v322_v4 }
  0x61   :  { %519 = vmatmul.f32.gmra.mxu2 %v312_v23  ;;  %819 = vperm.xlu0 %1063, %v795_v42  }
  0x62   :  { %316 = vmatmul.f32.gmra.mxu0 %v315_v32  ;;  %707 = vmatpush.msrb.mxu1 %v1369_v21 }
  0x63   :  { %1054 = vmatpush.msrb.mxu3 %v1369_v21  ;;  %893 = vperm.xlu2 %1065, %v877_v54   ;;  %v878_v21 = vld [vmem:[%s1679_s5 + $0x18] sm:$0xff] }
  0x64   :  { %644 = vmatpush.msrb.mxu0 %v1469_v35  ;;  %1039 = vmatpush.msrb.mxu2 %v1469_v35 }
  0x65   :  { %709 = vmatpush.msrb.mxu1 %v1398_v44  ;;  %1055 = vmatpush.msrb.mxu3 %v1398_v44  ;;  %v879_v44 = vld [vmem:[%s1679_s5 + $0x20] sm:$0xff] }
  0x66   :  { %441 = vmatmul.f32.gmra.mxu1 %v1538_v11  ;;  %648 = vmatpush.msrb.mxu0 %v1474_v38 }
  0x67   :  { %1040 = vmatpush.msrb.mxu2 %v1474_v38  ;;  %593 = vmatmul.f32.gmra.mxu3 %v321_v56 }
  0x68   :  { %652 = vmatpush.msrb.mxu0 %v1476_v5  ;;  %711 = vmatpush.msrb.mxu1 %v1417_v55 }
  0x69   :  { %524 = vmatmul.f32.gmra.mxu2 %v320_v31  ;;  %1056 = vmatpush.msrb.mxu3 %v1417_v55  ;;  %v796_v55 = vld [vmem:[%s1677_s3 + $0x28] sm:$0xff] }
  0x6a   :  { %324 = vmatmul.f32.gmra.mxu0 %v323_v59  ;;  %1041 = vmatpush.msrb.mxu2 %v1476_v5 }
  0x6b   :  { %656 = vmatpush.msrb.mxu0 %v1498_v0  ;;  %898 = vperm.xlu2 %1065, %v878_v21  }
  0x6c   :  { %1042 = vmatpush.msrb.mxu2 %v1498_v0  ;;  %713 = vmatpush.msrb.mxu1 %v1438_v10 }
  0x6d   :  { %660 = vmatpush.msrb.mxu0 %v1501_v3  ;;  %1057 = vmatpush.msrb.mxu3 %v1438_v10 }
  0x6e   :  { %445 = vmatmul.f32.gmra.mxu1 %v1562_v29  ;;  %1043 = vmatpush.msrb.mxu2 %v1501_v3 }
  0x6f   :  { %1058 = vmatpush.msrb.mxu3 %v1478_v8  ;;  %715 = vmatpush.msrb.mxu1 %v1478_v8 }
  0x71   :  { %674 = vmatmul.f32.vlgmr.msrb.gmra.mxu2 %v1519_v28  ;;  %1059 = vmatpush.msrb.mxu3 %v1484_v41 }
  0x72   :  { %662 = vmatmul.f32.vlgmr.msrb.gmra.mxu0 %v1472_v37  ;;  %731 = vmatmul.f32.vlgmr.msrb.gmra.mxu3 %v1519_v28 }
  0x73   :  { %717 = vmatpush.msrb.mxu1 %v1484_v41  ;;  %903 = vperm.xlu2 %1065, %v879_v44  }
  0x75   :  { %v1637_v5 = vpop.permute.xlu0 %751 }
  0x76   :  { %719 = vmatmul.f32.vlgmr.msrb.gmra.mxu1 %v1472_v37  ;;  %v1635_v37 = vpop.permute.xlu1 %761 }
  0x79   :  { %678 = vmatmul.f32.gmra.mxu2 %v1538_v11 }
  0x7a   :  { %666 = vmatmul.f32.gmra.mxu0 %v1482_v40  ;;  %735 = vmatmul.f32.gmra.mxu3 %v1538_v11 }
  0x7b   :  { %824 = vperm.xlu2 %1065, %v796_v55  }
  0x7c   :  { %v1639_v8 = vpop.permute.xlu2 %771 }
  0x7d   :  { %v757_v47 = vpop.permute.xlu0 %756 }
  0x7e   :  { %723 = vmatmul.f32.gmra.mxu1 %v1482_v40  ;;  %v1641_v46 = vpop.permute.xlu1 %766 }
  0x81   :  { %682 = vmatmul.f32.gmra.mxu2 %v1562_v29 }
  0x82   :  { %670 = vmatmul.f32.gmra.mxu0 %v1503_v14  ;;  %739 = vmatmul.f32.gmra.mxu3 %v1562_v29 }
  0x84   :  { %v1643_v52 = vpop.permute.xlu2 %776 }
  0x86   :  { %727 = vmatmul.f32.gmra.mxu1 %v1503_v14  ;;  %v1647_v62 = vpop.permute.xlu1 %804 }
  0x88   :  { %v1649_v63 = vpop.permute.xlu0 %799 }
  0x8e   :  { %v1651_v15 = vpop.permute.xlu1 %851 }
  0x8f   :  { %v842_v1 = vpop.permute.xlu2 %841 }
  0x91   :  { %v847_v19 = vpop.permute.xlu0 %846 }
  0x96   :  { %v857_v48 = vpop.permute.xlu1 %856 }
  0x99   :  { %v889_v60 = vpop.permute.xlu0 %888 }
  0xa3   :  { %v862_v24 = vpop.permute.xlu1 %861 }
  0xa6   :  { %v1655_v9 = vpop.permute.xlu0 %809 }
  0xb5   :  { %v884_v22 = vpop.permute.xlu2 %883 }
  0xbd   :  { %v1653_v33 = vpop.permute.xlu2 %893 }
  0xbf   :  { %v285_v10 = vpop.f32.mrf.mxu0 }
  0xc2   :  { %v564_v35 = vpop.f32.mrf.mxu3 }
  0xc3   :  { %v426_v36 = vpop.f32.mrf.mxu1 }
  0xc4   :  { %v500_v38 = vpop.f32.mrf.mxu2  ;;  %v427_v7 = vadd.f32 %v426_v36, %v285_v10 }
  0xc5   :  { %v899_v4 = vpop.permute.xlu2 %898 }
  0xc6   :  { %v501_v49 = vadd.f32 %v500_v38, %v427_v7 }
  0xc7   :  { %v293_v17 = vpop.f32.mrf.mxu0 }
  0xc8   :  { %v565_v2 = vadd.f32 %v564_v35, %v501_v49 }
  0xca   :  { %v570_v40 = vpop.f32.mrf.mxu3 }
  0xcb   :  { %v430_v41 = vpop.f32.mrf.mxu1 }
  0xcc   :  { %v505_v45 = vpop.f32.mrf.mxu2  ;;  %v431_v43 = vadd.f32 %v430_v41, %v293_v17 }
  0xce   :  { %v506_v27 = vadd.f32 %v505_v45, %v431_v43  ;;  %v904_v43 = vpop.permute.xlu2 %903 }
  0xcf   :  { %v301_v50 = vpop.f32.mrf.mxu0 }
  0xd0   :  { %v571_v42 = vadd.f32 %v570_v40, %v506_v27 }
  0xd2   :  { %v1645_v53 = vpop.f32.mrf.mxu3 }
  0xd3   :  { %v434_v51 = vpop.f32.mrf.mxu1 }
  0xd4   :  { %v510_v57 = vpop.f32.mrf.mxu2  ;;  %v435_v56 = vadd.f32 %v434_v51, %v301_v50 }
  0xd6   :  { %v511_v38 = vadd.f32 %v510_v57, %v435_v56 }
  0xd7   :  { %v309_v58 = vpop.f32.mrf.mxu0 }
  0xda   :  { %v582_v0 = vpop.f32.mrf.mxu3 }
  0xdb   :  { %v438_v3 = vpop.f32.mrf.mxu1 }
  0xdc   :  { %v515_v13 = vpop.f32.mrf.mxu2  ;;  %v439_v11 = vadd.f32 %v438_v3, %v309_v58 }
  0xde   :  { %v516_v12 = vadd.f32 %v515_v13, %v439_v11 }
  0xdf   :  { %v317_v14 = vpop.f32.mrf.mxu0 }
  0xe0   :  { %v583_v54 = vadd.f32 %v582_v0, %v516_v12 }
  0xe2   :  { %v588_v18 = vpop.f32.mrf.mxu3 }
  0xe3   :  { %v442_v6 = vpop.f32.mrf.mxu1 }
  0xe4   :  { %v520_v20 = vpop.f32.mrf.mxu2  ;;  %v443_v23 = vadd.f32 %v442_v6, %v317_v14  ;;  %v867_v6 = vpop.permute.xlu1 %866 }
  0xe6   :  { %v521_v31 = vadd.f32 %v520_v20, %v443_v23  ;;  %v577_v20 = vadd.f32 %v1645_v53, %v511_v38  ;;  %v825_v38 = vpop.permute.xlu2 %824 }
  0xe7   :  { %v325_v25 = vpop.f32.mrf.mxu0 }
  0xe8   :  { %v589_v55 = vadd.f32 %v588_v18, %v521_v31 }
  0xea   :  { %v594_v16 = vpop.f32.mrf.mxu3 }
  0xeb   :  { %v446_v26 = vpop.f32.mrf.mxu1 }
  0xec   :  { %v525_v28 = vpop.f32.mrf.mxu2  ;;  %v447_v10 = vadd.f32 %v446_v26, %v325_v25  ;;  %v815_v26 = vpop.permute.xlu0 %814 }
  0xee   :  { %v526_v50 = vadd.f32 %v525_v28, %v447_v10 }
  0xef   :  { %v663_v39 = vpop.f32.mrf.mxu0 }
  0xf0   :  { %v664_v34 = vadd.f32 %v663_v39, %v565_v2  ;;  %v595_v11 = vadd.f32 %v594_v16, %v526_v50 }
  0xf3   :  { %v720_v61 = vpop.f32.mrf.mxu1 }
  0xf4   :  { %v675_v30 = vpop.f32.mrf.mxu2  ;;  %v721_v59 = vadd.f32 %v720_v61, %v664_v34 }
  0xf5   :  { %v732_v29 = vpop.f32.mrf.mxu3  ;;  %v676_v44 = vadd.f32 %v675_v30, %v583_v54 }
  0xf6   :  { %v779_v41 = vadd.f32 %v1637_v5, %v721_v59  ;;  %v869_v45 = vmul.f32 %v842_v1, %v721_v59 }
  0xf7   :  { %v667_v32 = vpop.f32.mrf.mxu0  ;;  %v733_v13 = vadd.f32 %v732_v29, %v676_v44 }
  0xf8   :  { %v668_v21 = vadd.f32 %v667_v32, %v571_v42  ;;  %v785_v57 = vmax.f32 %v779_v41, 0.0  ;;  %v911_v7 = vadd.f32 %v884_v22, %v869_v45  ;;  %v909_v42 = vpop.permute.xlu1 %908 }
  0xf9   :  { %v782_v39 = vadd.f32 %v1641_v46, %v733_v13  ;;  %v872_v5 = vmul.f32 %v857_v48, %v733_v13 }
  0xfa   :  { %v917_v27 = vmul.f32 %v911_v7, %v721_v59 }
  0xfb   :  { %v724_v36 = vpop.f32.mrf.mxu1  ;;  %v788_v30 = vmax.f32 %v782_v39, 0.0  ;;  %v914_v46 = vadd.f32 %v899_v4, %v872_v5 }
  0xfc   :  { %v679_v17 = vpop.f32.mrf.mxu2  ;;  %v725_v35 = vadd.f32 %v724_v36, %v668_v21 }
  0xfd   :  { %v680_v58 = vadd.f32 %v679_v17, %v589_v55  ;;  %v736_v3 = vpop.f32.mrf.mxu3  ;;  %v830_v56 = vmul.f32 %v815_v26, %v788_v30  ;;  %v920_v54 = vmul.f32 %v914_v46, %v733_v13 }
  0xfe   :  { %v780_v14 = vadd.f32 %v757_v47, %v725_v35  ;;  %v870_v40 = vmul.f32 %v847_v19, %v725_v35 }
  0xff   :  { %v671_v51 = vpop.f32.mrf.mxu0  ;;  %v737_v0 = vadd.f32 %v736_v3, %v680_v58  ;;  %v926_v17 = vadd.f32 %v920_v54, %v830_v56 }
 0x100   :  { %v786_v18 = vmax.f32 %v780_v14, 0.0  ;;  %v912_v25 = vadd.f32 %v889_v60, %v870_v40  ;;  %v672_v1 = vadd.f32 %v671_v51, %v577_v20  ;;  %v827_v60 = vmul.f32 %v1649_v63, %v785_v57 }
 0x101   :  { %v783_v47 = vadd.f32 %v1639_v8, %v737_v0  ;;  %v873_v23 = vmul.f32 %v862_v24, %v737_v0 }
 0x102   :  { %v828_v28 = vmul.f32 %v1647_v62, %v786_v18  ;;  %v918_v49 = vmul.f32 %v912_v25, %v725_v35  ;;  %v923_v34 = vadd.f32 %v917_v27, %v827_v60 }
 0x103   :  { %v728_v19 = vpop.f32.mrf.mxu1  ;;  %v789_v2 = vmax.f32 %v783_v47, 0.0  ;;  %v915_v31 = vadd.f32 %v904_v43, %v873_v23 }
 0x104   :  { %v683_v61 = vpop.f32.mrf.mxu2  ;;  %v729_v53 = vadd.f32 %v728_v19, %v672_v1  ;;  %v924_v29 = vadd.f32 %v918_v49, %v828_v28 }
 0x105   :  { %v684_v12 = vadd.f32 %v683_v61, %v595_v11  ;;  %v740_v22 = vpop.f32.mrf.mxu3  ;;  %v921_v10 = vmul.f32 %v915_v31, %v737_v0  ;;  %v941_v0 = vstv %s1680_s6  ;;  %s970_s6 = sshll.u32 %s1681_s7, 4  ;;  %s971_s6 = int_to_ptr.hbm [resolvable:$true] %s970_s6 }
 0x106   :  { %v781_v48 = vadd.f32 %v1635_v37, %v729_v53  ;;  %v871_v16 = vmul.f32 %v1651_v15, %v729_v53  ;;  %v820_v37 = vpop.permute.xlu0 %819  ;;  %v929_v44 = vadd.f32 %v924_v29, %v923_v34 }
 0x107   :  { %v741_v8 = vadd.f32 %v740_v22, %v684_v12  ;;  %v831_v55 = vmul.f32 %v820_v37, %v789_v2 }
 0x108   :  { %v787_v62 = vmax.f32 %v781_v48, 0.0  ;;  %v913_v24 = vadd.f32 %v1653_v33, %v871_v16 }
 0x109   :  { %v784_v32 = vadd.f32 %v1643_v52, %v741_v8  ;;  %v874_v63 = vmul.f32 %v867_v6, %v741_v8  ;;  %v927_v52 = vadd.f32 %v921_v10, %v831_v55 }
 0x10a   :  { %v829_v4 = vmul.f32 %v1655_v9, %v787_v62  ;;  %v919_v59 = vmul.f32 %v913_v24, %v729_v53 }
 0x10b   :  { %v790_v21 = vmax.f32 %v784_v32, 0.0  ;;  %v916_v15 = vadd.f32 %v909_v42, %v874_v63 }
 0x10c   :  { %v925_v36 = vadd.f32 %v919_v59, %v829_v4 }
 0x10d   :  { %v832_v35 = vmul.f32 %v825_v38, %v790_v21  ;;  %v922_v41 = vmul.f32 %v916_v15, %v741_v8 }
 0x10e   :  { %v930_v33 = vadd.f32 %v929_v44, %v925_v36 }
 0x10f   :  { %v928_v58 = vadd.f32 %v922_v41, %v832_v35 }
 0x110   :  { %v931_v45 = vadd.f32 %v930_v33, %v926_v17 }
 0x112   :  { %v932_v3 = vadd.f32 %v931_v45, %v927_v52 }
 0x114   :  { %v933_v13 = vadd.f32 %v932_v3, %v928_v58 }
 0x116   :  { %v934_v14 = vrot.slane %v933_v13, 4 }
 0x118   :  { %v935_v9 = vadd.f32 %v934_v14, %v933_v13 }
 0x11a   :  { %v936_v40 = vrot.slane %v935_v9, 2 }
 0x11c   :  { %v937_v50 = vadd.f32 %v936_v40, %v935_v9 }
 0x11e   :  { %v938_v51 = vrot.slane %v937_v50, 1 }
 0x120   :  { %v939_v6 = vadd.f32 %v938_v51, %v937_v50 }
 0x122   :  { %v942_v20 = vadd.f32 %v941_v0, %v939_v6 }
 0x124   :  { %v1027_v18 = vmul.f32 -1.442695, %v942_v20 }
 0x126   :  { %1066 = vpow2.f32 %v1027_v18 }
 0x12c   :  { %v1067_v25 = vpop.eup %1066 }
 0x12d   :  { %v946_v26 = vadd.f32 1.0, %v1067_v25 }
 0x12f   :  { %1068 = vrcp.f32 %v946_v26  ;;  %v958_v5 = vand.u32 2147483648, %v946_v26  ;;  %v956_v43 = vand.u32 2147483647, %v946_v26  ;;  %vm952_vm1 = vweird.f32 %v946_v26 }
 0x131   :  { %v959_v47 = vor.u32 1.1754944e-38, %v958_v5  ;;  %vm957_vm3 = vcmp.eq.f32.partialorder %v956_v43, 8.507059e+37 }
 0x135   :  { %v1069_v57 = vpop.eup %1068 }
 0x136   :  { %v948_v7 = vmul.f32 %v1069_v57, %v946_v26  ;;  %vm953_vm0 = vweird.f32 %v1069_v57 }
 0x137   :  { %vm954_vm2 = vmor %vm952_vm1, %vm953_vm0 }
 0x138   :  { %v949_v39 = vsub.f32 1.0, %v948_v7 }
 0x13a   :  { %v950_v1 = vmul.f32 %v1069_v57, %v949_v39 }
 0x13c   :  { %v951_v11 = vadd.f32 %v1069_v57, %v950_v1 }
 0x13e   :  { %v955_v19 = vsel %vm954_vm2, %v1069_v57, %v951_v11 }
 0x13f   :  { %v960_v28 = vsel %vm957_vm3, %v959_v47, %v955_v19 }
 0x140   :  { %962 = vst [vmem:[#allocation3] sm:$0x1] %v960_v28 }
 0x141   :  { %973 = dma.vmem_to_hbm [thread:$0]  %s969_s11, 16, %s971_s6, [#allocation4]  }
 0x142   :  { %1094 = dma.done.wait [#allocation4], 16  }
 0x143   :  { %1095 = vsyncadd [#allocation4], 4294967280 }
 0x144   :  { %978 = vsyncpa [#allocation4], 1 }

</bundles_post_ra>
